<compile_context>
chip_gen: v5e
topology: v5e:2x2
jax: 0.10.0
libtpu: 0.0.40
codegen_flags: <defaults>
</compile_context>

<pallas_src>
import jax
import jax.numpy as jnp
from jax.experimental import pallas as pl
from jax.experimental.pallas import tpu as pltpu

HIDDEN = 50   # nn.Linear(inputs, 50) / nn.Linear(50, 50)
LANE = 128    # TPU vreg lane width


def _round_up(n, m):
    return ((n + m - 1) // m) * m


def _pad_axis(a, axis, target):
    pad = target - a.shape[axis]
    if pad <= 0:
        return a
    widths = [(0, 0)] * a.ndim
    widths[axis] = (0, pad)
    return jnp.pad(a, widths)


def _default_compute_dtype():
    # bf16 MXU inputs everywhere except v5e (no bf16 VPU path -> keep f32).
    try:
        kind = jax.devices()[0].device_kind.lower()
    except Exception:  # pragma: no cover - defensive: never fail dtype choice
        return jnp.float32
    if "v5 lite" in kind or "v5e" in kind:
        return jnp.float32
    return jnp.bfloat16


def _choose_batch_tile(B, d_in, x_itemsize):
    # Per-row VMEM cost: double-buffered x block + double-buffered padded f32 out block.
    per_row = 2 * d_in * x_itemsize + 2 * LANE * 4
    budget = 12 * 1024 * 1024          # headroom under v7x's ~32 MiB scoped VMEM
    bt = min(512, max(8, budget // max(per_row, 1)))
    bt = max(8, (int(bt) // 8) * 8)    # multiple of 8 sublanes
    bt = min(bt, _round_up(B, 8))      # never bigger than the (rounded) batch
    return max(bt, 8)


def mlp_kernel(x_ref, w1_ref, b1_ref, w2_ref, b2_ref, w3_ref, b3_ref, o_ref):
    """Whole MLP fused: 3 MXU matmuls with f32 accumulation + VPU ReLUs."""
    cdtype = x_ref.dtype
    x = x_ref[...]

    h1 = jnp.dot(x, w1_ref[...], preferred_element_type=jnp.float32) + b1_ref[...]
    h1 = jnp.maximum(h1, 0.0).astype(cdtype)

    h2 = jnp.dot(h1, w2_ref[...], preferred_element_type=jnp.float32) + b2_ref[...]
    h2 = jnp.maximum(h2, 0.0).astype(cdtype)

    h3 = jnp.dot(h2, w3_ref[...], preferred_element_type=jnp.float32) + b3_ref[...]
    o_ref[...] = h3.astype(o_ref.dtype)


def mlp_forward(x, params, *, batch_tile=None, compute_dtype=None):
    """Fused MLP forward. x: (B, d_in) float32. params: weights as (in, out), biases (1, N)."""
    B, d_in = x.shape
    d_out = params["w3"].shape[1]
    if compute_dtype is None:
        compute_dtype = _default_compute_dtype()

    h_pad = _round_up(HIDDEN, LANE)   # 128
    o_pad = _round_up(d_out, LANE)    # 128

    # Zero-pad weights/biases to lane-dense shapes (exact through Linear + ReLU).
    w1 = _pad_axis(params["w1"].astype(compute_dtype), 1, h_pad)                  # (d_in, 128)
    b1 = _pad_axis(params["b1"].astype(jnp.float32), 1, h_pad)                    # (1, 128)
    w2 = _pad_axis(_pad_axis(params["w2"].astype(compute_dtype), 0, h_pad), 1, h_pad)
    b2 = _pad_axis(params["b2"].astype(jnp.float32), 1, h_pad)
    w3 = _pad_axis(_pad_axis(params["w3"].astype(compute_dtype), 0, h_pad), 1, o_pad)
    b3 = _pad_axis(params["b3"].astype(jnp.float32), 1, o_pad)

    x_c = x.astype(compute_dtype)
    x_itemsize = jnp.dtype(compute_dtype).itemsize

    if batch_tile is None:
        batch_tile = _choose_batch_tile(B, d_in, x_itemsize)
    batch_tile = max(8, (int(batch_tile) // 8) * 8)

    # Pad the batch instead of asserting divisibility; padded rows are sliced off.
    B_pad = _round_up(B, batch_tile)
    if B_pad != B:
        x_c = _pad_axis(x_c, 0, B_pad)
    grid = (B_pad // batch_tile,)

    # Batch axis tiled across the grid; small weights/biases mapped to a fixed
    # block so they are only DMA'd once.
    in_specs = [
        pl.BlockSpec((batch_tile, d_in), lambda i: (i, 0)),   # x
        pl.BlockSpec((d_in, h_pad),      lambda i: (0, 0)),   # w1
        pl.BlockSpec((1, h_pad),         lambda i: (0, 0)),   # b1
        pl.BlockSpec((h_pad, h_pad),     lambda i: (0, 0)),   # w2
        pl.BlockSpec((1, h_pad),         lambda i: (0, 0)),   # b2
        pl.BlockSpec((h_pad, o_pad),     lambda i: (0, 0)),   # w3
        pl.BlockSpec((1, o_pad),         lambda i: (0, 0)),   # b3
    ]
    out_spec = pl.BlockSpec((batch_tile, o_pad), lambda i: (i, 0))

    weight_elems = d_in * h_pad + h_pad * h_pad + h_pad * o_pad
    flops = 2 * B_pad * weight_elems
    bytes_accessed = (
        B_pad * d_in * x_itemsize            # stream x in
        + B_pad * o_pad * 4                  # stream padded f32 output out
        + weight_elems * x_itemsize          # weights
        + (2 * h_pad + o_pad) * 4            # biases
    )
    cost = pl.CostEstimate(flops=int(flops), transcendentals=0,
                           bytes_accessed=int(bytes_accessed))

    out_padded = pl.pallas_call(
        mlp_kernel,
        out_shape=jax.ShapeDtypeStruct((B_pad, o_pad), jnp.float32),
        grid_spec=pltpu.PrefetchScalarGridSpec(
            num_scalar_prefetch=0,
            grid=grid,
            in_specs=in_specs,
            out_specs=out_spec,
        ),
        compiler_params=pltpu.CompilerParams(
            dimension_semantics=("parallel",),
            vmem_limit_bytes=32 * 1024 * 1024,
        ),
        cost_estimate=cost,
    )(x_c, w1, b1, w2, b2, w3, b3)

    return out_padded[:B, :d_out]


def init_params(key, inputs, outputs):
    """Deterministic init mimicking nn.Linear shapes (weights stored as (in, out))."""
    k1, k2, k3, k4, k5, k6 = jax.random.split(key, 6)
    scale1 = 1.0 / jnp.sqrt(float(inputs))
    scale2 = 1.0 / jnp.sqrt(float(HIDDEN))
    return {
        "w1": jax.random.uniform(k1, (inputs, HIDDEN), jnp.float32, -scale1, scale1),
        "b1": jax.random.uniform(k2, (1, HIDDEN), jnp.float32, -scale1, scale1),
        "w2": jax.random.uniform(k3, (HIDDEN, HIDDEN), jnp.float32, -scale2, scale2),
        "b2": jax.random.uniform(k4, (1, HIDDEN), jnp.float32, -scale2, scale2),
        "w3": jax.random.uniform(k5, (HIDDEN, outputs), jnp.float32, -scale2, scale2),
        "b3": jax.random.uniform(k6, (1, outputs), jnp.float32, -scale2, scale2),
    }


def mlp_reference(x, p, compute_dtype=jnp.float32):
    """Pure-JAX reference using the same compute dtype / f32 accumulation as the kernel."""
    cd = compute_dtype
    h1 = jnp.dot(x.astype(cd), p["w1"].astype(cd),
                 preferred_element_type=jnp.float32) + p["b1"]
    h1 = jnp.maximum(h1, 0.0)
    h2 = jnp.dot(h1.astype(cd), p["w2"].astype(cd),
                 preferred_element_type=jnp.float32) + p["b2"]
    h2 = jnp.maximum(h2, 0.0)
    return jnp.dot(h2.astype(cd), p["w3"].astype(cd),
                   preferred_element_type=jnp.float32) + p["b3"]


if __name__ == "__main__":
    key = jax.random.PRNGKey(0)
    k_params, k_x1, k_x2 = jax.random.split(key, 3)

    batch, inputs, outputs = 8, 32, 4
    params = init_params(k_params, inputs, outputs)
    cdtype = _default_compute_dtype()

    # jit the whole wrapper (pads + pallas_call + slice) so host-side padding
    # fuses into a single compiled executable instead of eager dispatches.
    fwd = jax.jit(lambda xx: mlp_forward(xx, params))

    # Case 1: small aligned batch.
    x = jax.random.normal(k_x1, (batch, inputs), jnp.float32)
    out = jax.block_until_ready(fwd(x))
    ref = mlp_reference(x, params, compute_dtype=cdtype)
    ref_f32 = mlp_reference(x, params, compute_dtype=jnp.float32)
    assert out.shape == (batch, outputs)
    assert jnp.allclose(out, ref, atol=1e-3, rtol=1e-3)
    assert jnp.allclose(out, ref_f32, atol=5e-2, rtol=5e-2)

    # Case 2: batch not a multiple of the sublane tile (exercises batch padding path).
    x2 = jax.random.normal(k_x2, (13, inputs), jnp.float32)
    out2 = jax.block_until_ready(fwd(x2))
    ref2 = mlp_reference(x2, params, compute_dtype=cdtype)
    assert out2.shape == (13, outputs)
    assert jnp.allclose(out2, ref2, atol=1e-3, rtol=1e-3)

    print("KERNEL_OK")
</pallas_src>

<mosaic_0001>
module attributes {stable_mosaic.version = 11 : i64} {
  func.func @mlp_kernel(%arg0: i32, %arg1: memref<8x32xbf16, #tpu.memory_space<vmem>>, %arg2: memref<32x128xbf16, #tpu.memory_space<vmem>>, %arg3: memref<1x128xf32, #tpu.memory_space<vmem>>, %arg4: memref<128x128xbf16, #tpu.memory_space<vmem>>, %arg5: memref<1x128xf32, #tpu.memory_space<vmem>>, %arg6: memref<128x128xbf16, #tpu.memory_space<vmem>>, %arg7: memref<1x128xf32, #tpu.memory_space<vmem>>, %arg8: memref<8x128xf32, #tpu.memory_space<vmem>>) attributes {dimension_semantics = [#tpu.dimension_semantics<parallel>], iteration_bounds = array<i64: 1>, scalar_prefetch = 0 : i64, scratch_operands = 0 : i64, tpu.core_type = #tpu.core_type<tc>, window_params = [{transform_indices = @transform_0, window_bounds = array<i64: 8, 32>}, {pipeline_mode = #tpu.pipeline_mode<synchronous>, transform_indices = @transform_1, window_bounds = array<i64: 32, 128>}, {pipeline_mode = #tpu.pipeline_mode<synchronous>, transform_indices = @transform_2, window_bounds = array<i64: 1, 128>}, {pipeline_mode = #tpu.pipeline_mode<synchronous>, transform_indices = @transform_3, window_bounds = array<i64: 128, 128>}, {pipeline_mode = #tpu.pipeline_mode<synchronous>, transform_indices = @transform_4, window_bounds = array<i64: 1, 128>}, {pipeline_mode = #tpu.pipeline_mode<synchronous>, transform_indices = @transform_5, window_bounds = array<i64: 128, 128>}, {pipeline_mode = #tpu.pipeline_mode<synchronous>, transform_indices = @transform_6, window_bounds = array<i64: 1, 128>}, {transform_indices = @transform_7, window_bounds = array<i64: 8, 128>}]} {
    %c0 = arith.constant 0 : index
    %c0_0 = arith.constant 0 : index
    %0 = vector.load %arg1[%c0, %c0_0] : memref<8x32xbf16, #tpu.memory_space<vmem>>, vector<8x32xbf16>
    %c0_1 = arith.constant 0 : index
    %c0_2 = arith.constant 0 : index
    %1 = vector.load %arg2[%c0_1, %c0_2] : memref<32x128xbf16, #tpu.memory_space<vmem>>, vector<32x128xbf16>
    %cst = arith.constant dense<0.000000e+00> : vector<8x128xf32>
    %2 = tpu.matmul %0, %1, %cst {dimension_numbers = #tpu.dot_dimension_numbers<[1], [0], [0], [1], [0, 0, 1, 1], [], []>} : vector<8x32xbf16>, vector<32x128xbf16>, vector<8x128xf32> -> vector<8x128xf32>
    %c0_3 = arith.constant 0 : index
    %c0_4 = arith.constant 0 : index
    %3 = vector.load %arg3[%c0_3, %c0_4] : memref<1x128xf32, #tpu.memory_space<vmem>>, vector<1x128xf32>
    %4 = vector.broadcast %3 : vector<1x128xf32> to vector<8x128xf32>
    %5 = arith.addf %2, %4 : vector<8x128xf32>
    %cst_5 = arith.constant 0.000000e+00 : f32
    %6 = vector.broadcast %cst_5 : f32 to vector<8x128xf32>
    %7 = arith.maximumf %5, %6 : vector<8x128xf32>
    %8 = arith.truncf %7 : vector<8x128xf32> to vector<8x128xbf16>
    %c0_6 = arith.constant 0 : index
    %c0_7 = arith.constant 0 : index
    %9 = vector.load %arg4[%c0_6, %c0_7] : memref<128x128xbf16, #tpu.memory_space<vmem>>, vector<128x128xbf16>
    %cst_8 = arith.constant dense<0.000000e+00> : vector<8x128xf32>
    %10 = tpu.matmul %8, %9, %cst_8 {dimension_numbers = #tpu.dot_dimension_numbers<[1], [0], [0], [1], [0, 0, 1, 1], [], []>} : vector<8x128xbf16>, vector<128x128xbf16>, vector<8x128xf32> -> vector<8x128xf32>
    %c0_9 = arith.constant 0 : index
    %c0_10 = arith.constant 0 : index
    %11 = vector.load %arg5[%c0_9, %c0_10] : memref<1x128xf32, #tpu.memory_space<vmem>>, vector<1x128xf32>
    %12 = vector.broadcast %11 : vector<1x128xf32> to vector<8x128xf32>
    %13 = arith.addf %10, %12 : vector<8x128xf32>
    %cst_11 = arith.constant 0.000000e+00 : f32
    %14 = vector.broadcast %cst_11 : f32 to vector<8x128xf32>
    %15 = arith.maximumf %13, %14 : vector<8x128xf32>
    %16 = arith.truncf %15 : vector<8x128xf32> to vector<8x128xbf16>
    %c0_12 = arith.constant 0 : index
    %c0_13 = arith.constant 0 : index
    %17 = vector.load %arg6[%c0_12, %c0_13] : memref<128x128xbf16, #tpu.memory_space<vmem>>, vector<128x128xbf16>
    %cst_14 = arith.constant dense<0.000000e+00> : vector<8x128xf32>
    %18 = tpu.matmul %16, %17, %cst_14 {dimension_numbers = #tpu.dot_dimension_numbers<[1], [0], [0], [1], [0, 0, 1, 1], [], []>} : vector<8x128xbf16>, vector<128x128xbf16>, vector<8x128xf32> -> vector<8x128xf32>
    %c0_15 = arith.constant 0 : index
    %c0_16 = arith.constant 0 : index
    %19 = vector.load %arg7[%c0_15, %c0_16] : memref<1x128xf32, #tpu.memory_space<vmem>>, vector<1x128xf32>
    %20 = vector.broadcast %19 : vector<1x128xf32> to vector<8x128xf32>
    %21 = arith.addf %18, %20 : vector<8x128xf32>
    %c0_17 = arith.constant 0 : index
    %c0_18 = arith.constant 0 : index
    %22 = vector.load %arg8[%c0_17, %c0_18] : memref<8x128xf32, #tpu.memory_space<vmem>>, vector<8x128xf32>
    tpu.vector_store %arg8[%c0_17, %c0_18], %21 {strides = array<i32>} : memref<8x128xf32, #tpu.memory_space<vmem>>, vector<8x128xf32>,
    return
  }
  func.func @transform_0(%arg0: i32) -> (i32, i32) {
    %c0_i32 = arith.constant 0 : i32
    %c0_i32_0 = arith.constant 0 : i32
    return %arg0, %c0_i32 : i32, i32
  }
  func.func @transform_1(%arg0: i32) -> (i32, i32) {
    %c0_i32 = arith.constant 0 : i32
    %c0_i32_0 = arith.constant 0 : i32
    %c0_i32_1 = arith.constant 0 : i32
    return %c0_i32, %c0_i32_0 : i32, i32
  }
  func.func @transform_2(%arg0: i32) -> (i32, i32) {
    %c0_i32 = arith.constant 0 : i32
    %c0_i32_0 = arith.constant 0 : i32
    %c0_i32_1 = arith.constant 0 : i32
    return %c0_i32, %c0_i32_0 : i32, i32
  }
  func.func @transform_3(%arg0: i32) -> (i32, i32) {
    %c0_i32 = arith.constant 0 : i32
    %c0_i32_0 = arith.constant 0 : i32
    %c0_i32_1 = arith.constant 0 : i32
    return %c0_i32, %c0_i32_0 : i32, i32
  }
  func.func @transform_4(%arg0: i32) -> (i32, i32) {
    %c0_i32 = arith.constant 0 : i32
    %c0_i32_0 = arith.constant 0 : i32
    %c0_i32_1 = arith.constant 0 : i32
    return %c0_i32, %c0_i32_0 : i32, i32
  }
  func.func @transform_5(%arg0: i32) -> (i32, i32) {
    %c0_i32 = arith.constant 0 : i32
    %c0_i32_0 = arith.constant 0 : i32
    %c0_i32_1 = arith.constant 0 : i32
    return %c0_i32, %c0_i32_0 : i32, i32
  }
  func.func @transform_6(%arg0: i32) -> (i32, i32) {
    %c0_i32 = arith.constant 0 : i32
    %c0_i32_0 = arith.constant 0 : i32
    %c0_i32_1 = arith.constant 0 : i32
    return %c0_i32, %c0_i32_0 : i32, i32
  }
  func.func @transform_7(%arg0: i32) -> (i32, i32) {
    %c0_i32 = arith.constant 0 : i32
    %c0_i32_0 = arith.constant 0 : i32
    return %arg0, %c0_i32 : i32, i32
  }
}

</mosaic_0001>

<bundles_post_ra>
// kernel: _lambda_.1
= control target key start
LH: loop header
LB: loop body
LE: loop exit
PB: predicated region body
PF: predicated region fallthrough
CT: control target
= control target key end

     0   :  { %12 = vsyncpa [#allocation3], 0  ;;  %s529_s0 = inlined_call_operand.vmem [shape: bf16[8,32], index: 0, kind: input, shape index: {}]   ;;  %s530_s1 = inlined_call_operand.hbm [shape: bf16[32,128], index: 1, kind: input, shape index: {}]   ;;  %s531_s2 = inlined_call_operand.vmem [shape: f32[1,128], index: 2, kind: input, shape index: {}]   ;;  %s532_s3 = inlined_call_operand.hbm [shape: bf16[128,128], index: 3, kind: input, shape index: {}]   ;;  %s533_s4 = inlined_call_operand.vmem [shape: f32[1,128], index: 4, kind: input, shape index: {}]   ;;  %s534_s5 = inlined_call_operand.hbm [shape: bf16[128,128], index: 5, kind: input, shape index: {}]   ;;  %s535_s6 = inlined_call_operand.vmem [shape: f32[1,128], index: 6, kind: input, shape index: {}]   ;;  %s536_s7 = inlined_call_operand.vmem [shape: f32[8,128], index: 7, kind: output, shape index: {}]  }
   0x1   :  { %13 = vsyncpa [#allocation5], 0  ;;  %s35_s26 = sshll.u32 %s532_s3, 4  ;;  %s460_s27 = smov [#allocation4]   ;;  %s36_s26 = int_to_ptr.hbm [resolvable:$true] %s35_s26 }
   0x2   :  { %s37_s28 = sshll.u32 %s460_s27, 4  ;;  %s20_s8 = sshll.u32 %s530_s1, 4  ;;  %s38_s28 = int_to_ptr.vmem [resolvable:$true] %s37_s28  ;;  %s21_s8 = int_to_ptr.hbm [resolvable:$true] %s20_s8 }
   0x3   :  { %s461_s9 = smov 64   ;;  %s462_s10 = smov 4  }
   0x4   :  { %43 = dma.hbm_to_vmem [thread:$0]  %s36_s26, 1024, %s38_s28, [#allocation5], %s461_s9, %s461_s9, %s462_s10  }
   0x5   :  { %s463_s11 = smov [#allocation2]   ;;  %s50_s15 = sshll.u32 %s534_s5, 4  ;;  %s51_s15 = int_to_ptr.hbm [resolvable:$true] %s50_s15 }
   0x6   :  { %s22_s12 = sshll.u32 %s463_s11, 4  ;;  %s464_s3 = smov [#allocation6]   ;;  %s23_s12 = int_to_ptr.vmem [resolvable:$true] %s22_s12 }
   0x7   :  { %28 = dma.hbm_to_vmem [thread:$0]  %s21_s8, 256, %s23_s12, [#allocation3], %s461_s9, %s461_s9, %s462_s10  }
   0x8   :  { %s52_s16 = sshll.u32 %s464_s3, 4  ;;  %s53_s16 = int_to_ptr.vmem [resolvable:$true] %s52_s16 }
   0x9   :  { %58 = dma.hbm_to_vmem [thread:$0]  %s51_s15, 1024, %s53_s16, [#allocation5], %s461_s9, %s461_s9, %s462_s10  }
   0xa   :  { %456 = dma.done.wait [#allocation3], 256  }
   0xb   :  { %457 = vsyncadd [#allocation3], 4294967040 }
   0xc   :  { %458 = dma.done.wait [#allocation5], 2048  }
   0xd   :  { %459 = vsyncadd [#allocation5], 4294965248  ;;  %v359_v0 = vld [vmem:[#allocation2 + $0x8] sm:$0xff]  ;;  %v358_v2 = vld [vmem:[#allocation2] sm:$0xff]  ;;  %vm95_vm0 = vcmask 261120  }
   0xe   :  { %v367_v1 = vld [vmem:[#allocation4 + $0x38] sm:$0xff]  ;;  %105 = vmatpush.bf16.msra.mxu0 %v359_v0  ;;  %v366_v3 = vld [vmem:[#allocation4 + $0x30] sm:$0xff]  ;;  %v365_v5 = vld [vmem:[#allocation4 + $0x28] sm:$0xff] }
   0xf   :  { %182 = vmatpush.bf16.msra.mxu1 %v367_v1  ;;  %v74_v4 = vld [vmem:[%s529_s0] sm:$0xf]  ;;  %v364_v6 = vld [vmem:[#allocation4 + $0x20] sm:$0xff]  ;;  %v363_v7 = vld [vmem:[#allocation4 + $0x18] sm:$0xff] }
  0x10   :  { %v362_v8 = vld [vmem:[#allocation4 + $0x10] sm:$0xff]  ;;  %v361_v9 = vld [vmem:[#allocation4 + $0x8] sm:$0xff]  ;;  %v360_v10 = vld [vmem:[#allocation4] sm:$0xff] }
  0x11   :  { %v375_v11 = vld [vmem:[#allocation6 + $0x38] sm:$0xff]  ;;  %v374_v12 = vld [vmem:[#allocation6 + $0x30] sm:$0xff]  ;;  %v373_v13 = vld [vmem:[#allocation6 + $0x28] sm:$0xff] }
  0x12   :  { %106 = vmatpush.bf16.msra.mxu0 %v358_v2  ;;  %265 = vmatpush.bf16.msra.mxu2 %v375_v11  ;;  %v372_v14 = vld [vmem:[#allocation6 + $0x20] sm:$0xff]  ;;  %v371_v15 = vld [vmem:[#allocation6 + $0x18] sm:$0xff]  ;;  %v370_v16 = vld [vmem:[#allocation6 + $0x10] sm:$0xff] }
  0x13   :  { %183 = vmatpush.bf16.msra.mxu1 %v366_v3  ;;  %v381_v17 = vld [vmem:[%s531_s2] ss:$0 sm:$0xff]  ;;  %v369_v23 = vld [vmem:[#allocation6 + $0x8] sm:$0xff]  ;;  %v368_v24 = vld [vmem:[#allocation6] sm:$0xff] }
  0x14   :  { %v382_v25 = vld [vmem:[%s533_s4] ss:$0 sm:$0xff] }
  0x15   :  { %293 = vmatmul.msk.bf16.vlgmr.msra.gmra.mxu0 %vm95_vm0, %v74_v4  ;;  %v383_v31 = vld [vmem:[%s535_s6] ss:$0 sm:$0xff] }
  0x16   :  { %266 = vmatpush.bf16.msra.mxu2 %v374_v12 }
  0x17   :  { %184 = vmatpush.bf16.msra.mxu1 %v365_v5 }
  0x1a   :  { %267 = vmatpush.bf16.msra.mxu2 %v373_v13 }
  0x1b   :  { %185 = vmatpush.bf16.msra.mxu1 %v364_v6 }
  0x1e   :  { %268 = vmatpush.bf16.msra.mxu2 %v372_v14 }
  0x1f   :  { %186 = vmatpush.bf16.msra.mxu1 %v363_v7 }
  0x22   :  { %269 = vmatpush.bf16.msra.mxu2 %v371_v15 }
  0x23   :  { %187 = vmatpush.bf16.msra.mxu1 %v362_v8 }
  0x26   :  { %270 = vmatpush.bf16.msra.mxu2 %v370_v16 }
  0x27   :  { %188 = vmatpush.bf16.msra.mxu1 %v361_v9 }
  0x2a   :  { %271 = vmatpush.bf16.msra.mxu2 %v369_v23 }
  0x2b   :  { %189 = vmatpush.bf16.msra.mxu1 %v360_v10 }
  0x2e   :  { %272 = vmatpush.bf16.msra.mxu2 %v368_v24 }
  0x92   :  { %v108_v18 = vpop.f32.mrf.mxu0 }
  0x93   :  { %v109_v19 = vadd.f32 %v381_v17, %v108_v18 }
  0x95   :  { %v112_v20 = vmax.f32 %v109_v19, 0.0 }
  0x97   :  { %v113_v21 = vpack.c.bf16 %v112_v20, %v112_v20 }
  0x99   :  { %190 = vmatmul.bf16.vlgmr.msra.gmra.mxu1 %v113_v21 }
  0x9a   :  { %v110_v22 = vpop.f32.mrf.mxu0 }
 0x116   :  { %v191_v26 = vpop.f32.mrf.mxu1 }
 0x117   :  { %v192_v27 = vadd.f32 %v382_v25, %v191_v26 }
 0x119   :  { %v195_v28 = vmax.f32 %v192_v27, 0.0 }
 0x11b   :  { %v196_v29 = vpack.c.bf16 %v195_v28, %v195_v28 }
 0x11d   :  { %273 = vmatmul.bf16.vlgmr.msra.gmra.mxu2 %v196_v29 }
 0x11e   :  { %v193_v30 = vpop.f32.mrf.mxu1 }
 0x1a0   :  { %v274_v32 = vpop.f32.mrf.mxu2 }
 0x1a1   :  { %v275_v33 = vadd.f32 %v383_v31, %v274_v32 }
 0x1a3   :  { %278 = vst [vmem:[%s536_s7] sm:$0xff] %v275_v33 }
 0x1a8   :  { %v276_v34 = vpop.f32.mrf.mxu2 }
 0x1a9   :  { %283 = vsyncpa [#allocation3], 1 }
 0x1aa   :  { %284 = vsyncpa [#allocation5], 1 }

</bundles_post_ra>
